<compile_context>
chip_gen: v6e
topology: v6e:2x2x1
jax: 0.10.0
libtpu: 0.0.40
codegen_flags: <defaults>
</compile_context>

<pallas_src>
import functools

import jax
import jax.numpy as jnp
from jax.experimental import pallas as pl
from jax.experimental.pallas import tpu as pltpu

HIDDEN_SIZE = 64


def qnet_kernel(xa_ref, w_in_ref, b_in_ref, w1_ref, b1_ref, w2_ref, b2_ref,
                o_ref):
    # Fused fcs/fca: one lane-dense (N = 2H = 128) matmul, bf16 operands,
    # f32 accumulation; bias + ReLU in f32.
    h = jnp.dot(xa_ref[...], w_in_ref[...],
                preferred_element_type=jnp.float32)               # (tb, 2H) f32
    h = jnp.maximum(h + b_in_ref[...], 0.0)
    # fc1 + ReLU (bf16 operands, f32 accumulate).
    h = jnp.dot(h.astype(jnp.bfloat16), w1_ref[...],
                preferred_element_type=jnp.float32)               # (tb, H) f32
    h = jnp.maximum(h + b1_ref[...], 0.0)
    # fc2: VPU multiply + XLU cross-lane reduce over H=64.  Avoids both an
    # N=1 MXU matmul and any transposed-RHS feed / vxpose of the (tb, H) tile.
    q = jnp.sum(h * w2_ref[...], axis=-1, keepdims=True)          # (tb, 1) f32
    q = q + b2_ref[0, 0]                                          # scalar bias (SMEM)
    o_ref[...] = q.astype(o_ref.dtype)


def prepare_params(params):
    """One-time (per parameter update) fusion/packing of the QNetwork params.

    Fuses fcs/fca into a single block-diagonal input layer and casts the MXU
    operands to bf16 (accumulation stays f32 inside the kernel)."""
    ws, bs, wa, ba, w1, b1, w2, b2 = params
    H = HIDDEN_SIZE
    state_dim, action_dim = ws.shape[0], wa.shape[0]
    d_in = state_dim + action_dim

    w_in = jnp.zeros((d_in, 2 * H), jnp.float32)
    w_in = w_in.at[:state_dim, :H].set(ws)
    w_in = w_in.at[state_dim:, H:].set(wa)
    b_in = jnp.concatenate([bs.reshape(1, H), ba.reshape(1, H)], axis=-1)

    return (
        w_in.astype(jnp.bfloat16),                 # (d_in, 2H) bf16
        b_in.astype(jnp.float32),                  # (1, 2H)    f32
        w1.astype(jnp.bfloat16),                   # (2H, H)    bf16
        b1.reshape(1, H).astype(jnp.float32),      # (1, H)     f32
        w2.reshape(1, H).astype(jnp.float32),      # (1, H)     f32 (VPU fc2)
        b2.reshape(1, 1).astype(jnp.float32),      # (1, 1)     SMEM scalar
    )


def _pick_tile(B, tb_request):
    """Batch tile: 16-row tiles for tiny batches, lane-aligned tiles otherwise,
    capped so large batches give >= 2 grid steps (v7x dual-TC sharding)."""
    if B < 128:
        return max(16, pl.cdiv(B, 16) * 16)
    tb = max(128, (int(tb_request) // 128) * 128)
    b_ceil = pl.cdiv(B, 128) * 128
    tb = min(tb, b_ceil)
    if b_ceil >= 256:
        # >=2 "parallel" steps so both TensorCores get work on v7x; on
        # single-TC chips this adds at most one ~0.35us grid step.
        tb = min(tb, max(128, (pl.cdiv(b_ceil, 2) // 128) * 128))
    return tb


@functools.partial(jax.jit, static_argnames=("tb",))
def qnetwork_forward(x, a, fused_params, *, tb=2048):
    """Fused QNetwork forward. `fused_params` comes from prepare_params().
    Returns q of shape (B, 1), float32."""
    w_in, b_in, w1, b1, w2_row, b2 = fused_params
    B = x.shape[0]
    d_in = x.shape[1] + a.shape[1]

    # concat + cast + pad fuse with the pallas_call under this jit.
    xa = jnp.concatenate([x, a], axis=-1).astype(jnp.bfloat16)    # (B, d_in)

    tb = _pick_tile(B, tb)
    b_pad = pl.cdiv(B, tb) * tb
    if b_pad != B:
        xa = jnp.pad(xa, ((0, b_pad - B), (0, 0)))
    grid = (b_pad // tb,)

    rep = lambda shape: pl.BlockSpec(shape, lambda i: (0, 0))     # resident params

    out = pl.pallas_call(
        qnet_kernel,
        out_shape=jax.ShapeDtypeStruct((b_pad, 1), jnp.float32),
        grid_spec=pltpu.PrefetchScalarGridSpec(
            num_scalar_prefetch=0,
            grid=grid,
            in_specs=[
                pl.BlockSpec((tb, d_in), lambda i: (i, 0)),       # xa batch tile
                rep(w_in.shape),                                  # blockdiag W (bf16)
                rep(b_in.shape),                                  # fused bias
                rep(w1.shape),                                    # W1 (bf16)
                rep(b1.shape),                                    # b1
                rep(w2_row.shape),                                # w2 row (f32)
                pl.BlockSpec(memory_space=pltpu.MemorySpace.SMEM),  # b2 scalar
            ],
            out_specs=pl.BlockSpec((tb, 1), lambda i: (i, 0)),
        ),
        compiler_params=pltpu.CompilerParams(
            dimension_semantics=("parallel",)),
    )(xa, w_in, b_in, w1, b1, w2_row, b2)

    # Padded rows produce non-zero garbage q values; the slice MUST stay
    # adjacent to the pallas_call (do not reduce over `out` before slicing).
    return out[:B]


def init_params(key, state_dim, action_dim):
    """Deterministic param init (PyTorch Linear-style uniform fan-in bound)."""
    H = HIDDEN_SIZE
    keys = jax.random.split(key, 8)

    def linear(kw, kb, fan_in, fan_out):
        bound = 1.0 / jnp.sqrt(fan_in)
        w = jax.random.uniform(kw, (fan_in, fan_out), jnp.float32, -bound, bound)
        b = jax.random.uniform(kb, (1, fan_out), jnp.float32, -bound, bound)
        return w, b

    ws, bs = linear(keys[0], keys[1], state_dim, H)
    wa, ba = linear(keys[2], keys[3], action_dim, H)
    w1, b1 = linear(keys[4], keys[5], 2 * H, H)
    w2, b2 = linear(keys[6], keys[7], H, 1)
    return (ws, bs, wa, ba, w1, b1, w2, b2)


def reference_forward(x, a, params):
    ws, bs, wa, ba, w1, b1, w2, b2 = params
    h1 = jnp.maximum(x @ ws + bs, 0.0)
    h2 = jnp.maximum(a @ wa + ba, 0.0)
    h = jnp.concatenate([h1, h2], axis=-1)
    h = jnp.maximum(h @ w1 + b1, 0.0)
    return h @ w2 + b2


if __name__ == "__main__":
    B, state_dim, action_dim = 16, 12, 4

    key = jax.random.PRNGKey(0)
    kx, ka, kp = jax.random.split(key, 3)
    x = jax.random.normal(kx, (B, state_dim), jnp.float32)
    a = jax.random.normal(ka, (B, action_dim), jnp.float32)
    params = init_params(kp, state_dim, action_dim)
    fused = prepare_params(params)   # hoisted: once per parameter update

    # tiny batch: single 16-row tile, no 128-row padding
    q = jax.block_until_ready(qnetwork_forward(x, a, fused))
    q_ref = reference_forward(x, a, params)
    assert q.shape == (B, 1)
    # bf16 MXU operands (f32 accumulate) vs f32 reference -> loosened tolerance
    assert jnp.allclose(q, q_ref, atol=5e-2, rtol=5e-2)

    # larger, non-multiple batch: exercises padding and a 2-step parallel grid
    B2 = 1000
    kx2, ka2 = jax.random.split(jax.random.PRNGKey(1), 2)
    x2 = jax.random.normal(kx2, (B2, state_dim), jnp.float32)
    a2 = jax.random.normal(ka2, (B2, action_dim), jnp.float32)
    q2 = jax.block_until_ready(qnetwork_forward(x2, a2, fused))
    q2_ref = reference_forward(x2, a2, params)
    assert q2.shape == (B2, 1)
    assert jnp.allclose(q2, q2_ref, atol=5e-2, rtol=5e-2)

    print("KERNEL_OK")
</pallas_src>

<mosaic_0001>
module attributes {stable_mosaic.version = 11 : i64} {
  func.func @qnet_kernel(%arg0: i32, %arg1: memref<16x16xbf16, #tpu.memory_space<vmem>>, %arg2: memref<16x128xbf16, #tpu.memory_space<vmem>>, %arg3: memref<1x128xf32, #tpu.memory_space<vmem>>, %arg4: memref<128x64xbf16, #tpu.memory_space<vmem>>, %arg5: memref<1x64xf32, #tpu.memory_space<vmem>>, %arg6: memref<1x64xf32, #tpu.memory_space<vmem>>, %arg7: memref<1x1xf32, #tpu.memory_space<smem>>, %arg8: memref<16x1xf32, #tpu.memory_space<vmem>>) attributes {dimension_semantics = [#tpu.dimension_semantics<parallel>], iteration_bounds = array<i64: 1>, scalar_prefetch = 0 : i64, scratch_operands = 0 : i64, tpu.core_type = #tpu.core_type<tc>, window_params = [{transform_indices = @transform_0, window_bounds = array<i64: 16, 16>}, {pipeline_mode = #tpu.pipeline_mode<synchronous>, transform_indices = @transform_1, window_bounds = array<i64: 16, 128>}, {pipeline_mode = #tpu.pipeline_mode<synchronous>, transform_indices = @transform_2, window_bounds = array<i64: 1, 128>}, {pipeline_mode = #tpu.pipeline_mode<synchronous>, transform_indices = @transform_3, window_bounds = array<i64: 128, 64>}, {pipeline_mode = #tpu.pipeline_mode<synchronous>, transform_indices = @transform_4, window_bounds = array<i64: 1, 64>}, {pipeline_mode = #tpu.pipeline_mode<synchronous>, transform_indices = @transform_5, window_bounds = array<i64: 1, 64>}, {transform_indices = @transform_6, window_bounds = array<i64: 1, 1>}, {transform_indices = @transform_7, window_bounds = array<i64: 16, 1>}]} {
    %c0 = arith.constant 0 : index
    %c0_0 = arith.constant 0 : index
    %0 = vector.load %arg1[%c0, %c0_0] : memref<16x16xbf16, #tpu.memory_space<vmem>>, vector<16x16xbf16>
    %c0_1 = arith.constant 0 : index
    %c0_2 = arith.constant 0 : index
    %1 = vector.load %arg2[%c0_1, %c0_2] : memref<16x128xbf16, #tpu.memory_space<vmem>>, vector<16x128xbf16>
    %cst = arith.constant dense<0.000000e+00> : vector<16x128xf32>
    %2 = tpu.matmul %0, %1, %cst {dimension_numbers = #tpu.dot_dimension_numbers<[1], [0], [0], [1], [0, 0, 1, 1], [], []>} : vector<16x16xbf16>, vector<16x128xbf16>, vector<16x128xf32> -> vector<16x128xf32>
    %c0_3 = arith.constant 0 : index
    %c0_4 = arith.constant 0 : index
    %3 = vector.load %arg3[%c0_3, %c0_4] : memref<1x128xf32, #tpu.memory_space<vmem>>, vector<1x128xf32>
    %4 = vector.broadcast %3 : vector<1x128xf32> to vector<16x128xf32>
    %5 = arith.addf %2, %4 : vector<16x128xf32>
    %cst_5 = arith.constant 0.000000e+00 : f32
    %6 = vector.broadcast %cst_5 : f32 to vector<16x128xf32>
    %7 = arith.maximumf %5, %6 : vector<16x128xf32>
    %8 = arith.truncf %7 : vector<16x128xf32> to vector<16x128xbf16>
    %c0_6 = arith.constant 0 : index
    %c0_7 = arith.constant 0 : index
    %9 = vector.load %arg4[%c0_6, %c0_7] : memref<128x64xbf16, #tpu.memory_space<vmem>>, vector<128x64xbf16>
    %cst_8 = arith.constant dense<0.000000e+00> : vector<16x64xf32>
    %10 = tpu.matmul %8, %9, %cst_8 {dimension_numbers = #tpu.dot_dimension_numbers<[1], [0], [0], [1], [0, 0, 1, 1], [], []>} : vector<16x128xbf16>, vector<128x64xbf16>, vector<16x64xf32> -> vector<16x64xf32>
    %c0_9 = arith.constant 0 : index
    %c0_10 = arith.constant 0 : index
    %11 = vector.load %arg5[%c0_9, %c0_10] : memref<1x64xf32, #tpu.memory_space<vmem>>, vector<1x64xf32>
    %12 = vector.broadcast %11 : vector<1x64xf32> to vector<16x64xf32>
    %13 = arith.addf %10, %12 : vector<16x64xf32>
    %cst_11 = arith.constant 0.000000e+00 : f32
    %14 = vector.broadcast %cst_11 : f32 to vector<16x64xf32>
    %15 = arith.maximumf %13, %14 : vector<16x64xf32>
    %c0_12 = arith.constant 0 : index
    %c0_13 = arith.constant 0 : index
    %16 = vector.load %arg6[%c0_12, %c0_13] : memref<1x64xf32, #tpu.memory_space<vmem>>, vector<1x64xf32>
    %17 = vector.broadcast %16 : vector<1x64xf32> to vector<16x64xf32>
    %18 = arith.mulf %15, %17 : vector<16x64xf32>
    %cst_14 = arith.constant dense<0.000000e+00> : vector<16xf32>
    %19 = vector.multi_reduction <add>, %18, %cst_14 [1] : vector<16x64xf32> to vector<16xf32>
    %20 = vector.shape_cast %19 : vector<16xf32> to vector<16x1xf32>
    %c0_15 = arith.constant 0 : index
    %c0_16 = arith.constant 0 : index
    %21 = memref.load %arg7[%c0_15, %c0_16] : memref<1x1xf32, #tpu.memory_space<smem>>
    %22 = vector.broadcast %21 : f32 to vector<16x1xf32>
    %23 = arith.addf %20, %22 : vector<16x1xf32>
    %c0_17 = arith.constant 0 : index
    %c0_18 = arith.constant 0 : index
    %24 = vector.load %arg8[%c0_17, %c0_18] : memref<16x1xf32, #tpu.memory_space<vmem>>, vector<16x1xf32>
    tpu.vector_store %arg8[%c0_17, %c0_18], %23 {strides = array<i32>} : memref<16x1xf32, #tpu.memory_space<vmem>>, vector<16x1xf32>,
    return
  }
  func.func @transform_0(%arg0: i32) -> (i32, i32) {
    %c0_i32 = arith.constant 0 : i32
    %c0_i32_0 = arith.constant 0 : i32
    return %arg0, %c0_i32 : i32, i32
  }
  func.func @transform_1(%arg0: i32) -> (i32, i32) {
    %c0_i32 = arith.constant 0 : i32
    %c0_i32_0 = arith.constant 0 : i32
    %c0_i32_1 = arith.constant 0 : i32
    return %c0_i32, %c0_i32_0 : i32, i32
  }
  func.func @transform_2(%arg0: i32) -> (i32, i32) {
    %c0_i32 = arith.constant 0 : i32
    %c0_i32_0 = arith.constant 0 : i32
    %c0_i32_1 = arith.constant 0 : i32
    return %c0_i32, %c0_i32_0 : i32, i32
  }
  func.func @transform_3(%arg0: i32) -> (i32, i32) {
    %c0_i32 = arith.constant 0 : i32
    %c0_i32_0 = arith.constant 0 : i32
    %c0_i32_1 = arith.constant 0 : i32
    return %c0_i32, %c0_i32_0 : i32, i32
  }
  func.func @transform_4(%arg0: i32) -> (i32, i32) {
    %c0_i32 = arith.constant 0 : i32
    %c0_i32_0 = arith.constant 0 : i32
    %c0_i32_1 = arith.constant 0 : i32
    return %c0_i32, %c0_i32_0 : i32, i32
  }
  func.func @transform_5(%arg0: i32) -> (i32, i32) {
    %c0_i32 = arith.constant 0 : i32
    %c0_i32_0 = arith.constant 0 : i32
    %c0_i32_1 = arith.constant 0 : i32
    return %c0_i32, %c0_i32_0 : i32, i32
  }
  func.func @transform_6(%arg0: i32) -> (i32, i32) {
    %c0_i32 = arith.constant 0 : i32
    %c0_i32_0 = arith.constant 0 : i32
    %c0_i32_1 = arith.constant 0 : i32
    return %c0_i32, %c0_i32_0 : i32, i32
  }
  func.func @transform_7(%arg0: i32) -> (i32, i32) {
    %c0_i32 = arith.constant 0 : i32
    %c0_i32_0 = arith.constant 0 : i32
    return %arg0, %c0_i32 : i32, i32
  }
}

</mosaic_0001>

<bundles_post_ra>
// kernel: qnetwork_forward.1
= control target key start
LH: loop header
LB: loop body
LE: loop exit
PB: predicated region body
PF: predicated region fallthrough
CT: control target
= control target key end

     0   :  { %v302_v0 = vmov 0.0   ;;  %vm303_vm0 = vmmov 0   ;;  %vm50_vm1 = vcmask 130048   ;;  %vm221_vm2 = vcmask 523264   ;;  %s392_s1 = inlined_call_operand.vmem [shape: bf16[16,128], index: 1, kind: input, shape index: {}]   ;;  %s393_s0 = inlined_call_operand.vmem [shape: bf16[16,16], index: 0, kind: input, shape index: {}]   ;;  %s394_s3 = inlined_call_operand.vmem [shape: bf16[128,64], index: 3, kind: input, shape index: {}]   ;;  %s395_s2 = inlined_call_operand.vmem [shape: f32[1,128], index: 2, kind: input, shape index: {}]   ;;  %s396_s4 = inlined_call_operand.vmem [shape: f32[1,64], index: 4, kind: input, shape index: {}]   ;;  %s397_s5 = inlined_call_operand.vmem [shape: f32[1,64], index: 5, kind: input, shape index: {}]   ;;  %s398_s6 = inlined_call_operand.<no memory space> [shape: f32[1,1], index: 6, kind: input, shape index: {}]   ;;  %s399_s7 = inlined_call_operand.vmem [shape: f32[16,1], index: 7, kind: output, shape index: {}]  }
   0x1   :  { %264 = vmatprep.subr.bf16.mxu0 %v302_v0  ;;  %v292_v1 = vld [vmem:[%s392_s1] sm:$0xff]   ;;  %266 = vmatprep.mubr.msk.bf16.mxu0 %vm303_vm0, %v302_v0  ;;  %v294_v3 = vld [vmem:[%s394_s3 + $0x38] sm:$0xff]   ;;  %v295_v4 = vld [vmem:[%s394_s3 + $0x30] sm:$0xff]   ;;  %v229_v35 = vstv %s398_s6  ;;  %vm232_vm3 = vcmask 7168  }
   0x2   :  { %v293_v2 = vld [vmem:[%s393_s0] sm:$0xff]   ;;  %270 = vmatprep.subr.bf16.mxu1 %v302_v0  ;;  %286 = vmatprep.mubr.msk.bf16.mxu1 %vm303_vm0, %v302_v0  ;;  %v296_v5 = vld [vmem:[%s394_s3 + $0x28] sm:$0xff]   ;;  %v298_v7 = vld [vmem:[%s394_s3 + $0x18] sm:$0xff]  }
   0x3   :  { %265 = vmatpush3.bf16.msra.mxu0 %v292_v1  ;;  %271 = vmatpush3.bf16.msra.mxu1 %v294_v3  ;;  %v297_v6 = vld [vmem:[%s394_s3 + $0x20] sm:$0xff]   ;;  %v299_v8 = vld [vmem:[%s394_s3 + $0x10] sm:$0xff]   ;;  %v300_v9 = vld [vmem:[%s394_s3 + $0x8] sm:$0xff]  }
   0x4   :  { %272 = vmatprep.subr.bf16.mxu1 %v302_v0  ;;  %v301_v10 = vld [vmem:[%s394_s3] sm:$0xff]  }
   0x5   :  { %v239_v11 = vld [vmem:[%s395_s2] ss:$0 sm:$0xff] }
   0x6   :  { %267 = vmatmul.mubr.msk.bf16.vlgmr.msra.gmra.mxu0 %vm50_vm1, %v293_v2  ;;  %v243_v21 = vld [vmem:[%s396_s4] ss:$0 sm:$0xff] }
   0x7   :  { %273 = vmatpush3.bf16.msra.mxu1 %v295_v4  ;;  %v252_v25 = vld [vmem:[%s397_s5] ss:$0 sm:$0xff] }
   0x8   :  { %274 = vmatprep.subr.bf16.mxu1 %v302_v0 }
   0xb   :  { %275 = vmatpush3.bf16.msra.mxu1 %v296_v5 }
   0xc   :  { %276 = vmatprep.subr.bf16.mxu1 %v302_v0 }
   0xf   :  { %277 = vmatpush3.bf16.msra.mxu1 %v297_v6 }
  0x10   :  { %278 = vmatprep.subr.bf16.mxu1 %v302_v0 }
  0x13   :  { %279 = vmatpush3.bf16.msra.mxu1 %v298_v7 }
  0x14   :  { %280 = vmatprep.subr.bf16.mxu1 %v302_v0 }
  0x17   :  { %281 = vmatpush3.bf16.msra.mxu1 %v299_v8 }
  0x18   :  { %282 = vmatprep.subr.bf16.mxu1 %v302_v0 }
  0x1b   :  { %283 = vmatpush3.bf16.msra.mxu1 %v300_v9 }
  0x1c   :  { %284 = vmatprep.subr.bf16.mxu1 %v302_v0 }
  0x1f   :  { %285 = vmatpush3.bf16.msra.mxu1 %v301_v10 }
  0xc6   :  { %v88_v12 = vpop.f32.mrf.mxu0 }
  0xc7   :  { %v89_v14 = vadd.f32 %v239_v11, %v88_v12 }
  0xc8   :  { %v268_v13 = vpop.f32.mrf.mxu0 }
  0xc9   :  { %v95_v18 = vmax.f32 %v89_v14, 0.0 }
  0xca   :  { %v91_v15 = vpop.f32.mrf.mxu0 }
  0xcb   :  { %v92_v16 = vadd.f32 %v239_v11, %v91_v15 }
  0xcc   :  { %v269_v17 = vpop.f32.mrf.mxu0 }
  0xcd   :  { %v96_v19 = vmax.f32 %v92_v16, 0.0 }
  0xcf   :  { %v97_v20 = vpack.c.bf16 %v96_v19, %v95_v18 }
  0xd1   :  { %287 = vmatmul.mubr.bf16.vlgmr.msra.gmra.mxu1 %v97_v20 }
 0x191   :  { %v203_v22 = vpop.f32.mrf.mxu1 }
 0x192   :  { %v204_v23 = vadd.f32 %v243_v21, %v203_v22 }
 0x193   :  { %v288_v24 = vpop.f32.mrf.mxu1 }
 0x194   :  { %v210_v26 = vmax.f32 %v204_v23, 0.0 }
 0x195   :  { %v206_v27 = vpop.f32.mrf.mxu1 }
 0x196   :  { %v207_v28 = vadd.f32 %v243_v21, %v206_v27  ;;  %v219_v29 = vmul.f32 %v252_v25, %v210_v26 }
 0x197   :  { %v289_v30 = vpop.f32.mrf.mxu1 }
 0x198   :  { %v211_v31 = vmax.f32 %v207_v28, 0.0  ;;  %v222_v32 = vsel %vm221_vm2, %v219_v29, 0.0 }
 0x199   :  { %223 = vadd.xlane.f32.xlu0 %v222_v32 }
 0x19a   :  { %v220_v33 = vmul.f32 %v252_v25, %v211_v31 }
 0x19c   :  { %v225_v34 = vsel %vm221_vm2, %v220_v33, 0.0 }
 0x19d   :  { %226 = vadd.xlane.f32.xlu0 %v225_v34 }
 0x222   :  { %v224_v36 = vpop.xlane.xlu0 %223 }
 0x223   :  { %v230_v37 = vadd.f32 %v229_v35, %v224_v36 }
 0x225   :  { %233 = vst.msk [vmem:[%s399_s7] sm:$0xff] %vm232_vm3, %v230_v37 }
 0x226   :  { %v227_v38 = vpop.xlane.xlu0 %226 }
 0x227   :  { %v231_v39 = vadd.f32 %v229_v35, %v227_v38 }
 0x229   :  { %234 = vst.msk [vmem:[%s399_s7 + $0x8] sm:$0xff] %vm232_vm3, %v231_v39 }

</bundles_post_ra>
